<compile_context>
chip_gen: v7x
topology: tpu7x:2x2x1
jax: 0.10.0
libtpu: 0.0.40
codegen_flags: <defaults>
</compile_context>

<pallas_src>
import functools

import jax
import jax.numpy as jnp
from jax.experimental import pallas as pl
from jax.experimental.pallas import tpu as pltpu


# ---------------------------------------------------------------------------
# small helpers
# ---------------------------------------------------------------------------
def _cdiv(a: int, b: int) -> int:
    return -(-a // b)


def _round_up(a: int, b: int) -> int:
    return _cdiv(a, b) * b


@functools.cache
def _vmem_capacity_bytes() -> int:
    """Physical VMEM per TensorCore (128 MiB v5e/v6e, 64 MiB v7x)."""
    try:
        cap = getattr(pltpu.get_tpu_info(), "vmem_capacity_bytes", None)
        if cap:
            return int(cap)
    except Exception:
        pass
    return 64 * 1024 * 1024  # conservative fallback (v7x per-TC physical)


def _vmem_limit_bytes() -> int:
    # ~75% of physical VMEM: leaves headroom for double buffers / compiler
    # scratch instead of handing Mosaic the entire physical VMEM.
    return int(_vmem_capacity_bytes() * 3 // 4)


# Live block-sized f32 arrays per grid step: input+output double-buffered (4x)
# plus ~8 roll/temporary arrays (x_up/x_dn, t, u, t_l/r, u_l/r, gx, gy) held
# in the kernel body.  Used to bound block sizes so VMEM never over-subscribes.
_LIVE_FACTOR = 12


def _roll(a, shift: int, axis: int):
    """pltpu.roll with a static-shift zero guard.

    pltpu.roll follows the jnp.roll convention: result[..., j, ...] =
    a[..., (j - shift) % n, ...]."""
    n = a.shape[axis]
    s = shift % n
    if s == 0:
        return a
    return pltpu.roll(a, s, axis=axis)


# ---------------------------------------------------------------------------
# kernel 1: whole (small, narrow) planes, flattened so the lane axis is H*W
# ---------------------------------------------------------------------------
def _sobel_flat_kernel(x_ref, mask_ref, o_ref, *, W: int):
    """x_ref/o_ref: (1, P, L) block; each of the P rows is one image plane
    flattened row-major to L = H*W lanes (lane-dense even for small W).

    mask_ref: (4, L) f32 0/1 boundary masks:
      row 0: a row above exists   (flat index >= W)
      row 1: a row below exists   (flat index <  L - W)
      row 2: a left  neighbour exists (col != 0)
      row 3: a right neighbour exists (col != W - 1)
    """
    x = x_ref[0]                                   # (P, L) f32
    L = x.shape[-1]
    m = mask_ref[...]                              # (4, L)
    has_up, has_dn = m[0:1, :], m[1:2, :]
    has_l, has_r = m[2:3, :], m[3:4, :]

    # vertical taps: rows are W apart along the flattened lane axis
    x_up = _roll(x, W, 1) * has_up                 # x[i-1, j]; 0 above the image
    x_dn = _roll(x, L - W, 1) * has_dn             # x[i+1, j]; 0 below the image

    t = x_up + 2.0 * x + x_dn                      # vertical [1, 2, 1]
    u = x_up - x_dn                                # vertical [1, 0, -1]

    # horizontal taps
    t_l = _roll(t, 1, 1) * has_l
    t_r = _roll(t, L - 1, 1) * has_r
    u_l = _roll(u, 1, 1) * has_l
    u_r = _roll(u, L - 1, 1) * has_r

    gx = t_l - t_r                                 # = Gx / 2
    gy = u_l + 2.0 * u + u_r                       # = Gy / 2
    o_ref[0] = 2.0 * jnp.sqrt(gx * gx + gy * gy)


# ---------------------------------------------------------------------------
# kernel 2: lane-dense 2-D row strips (bounded VMEM per grid step)
# ---------------------------------------------------------------------------
def _sobel_strip_kernel(x_ref, top_ref, bot_ref, o_ref):
    """x_ref/o_ref: (1, TH, W) strip of one plane.  top_ref/bot_ref are
    (1, 8, W) blocks whose last/first row is the row just above/below the
    strip (index_map clamped at the image edges; contributions zeroed there)."""
    s = pl.program_id(1)
    ns = pl.num_programs(1)

    x = x_ref[0]                                   # (TH, W) f32
    TH, W = x.shape

    top = top_ref[0, 7:8, :] * (s > 0).astype(jnp.float32)       # (1, W)
    bot = bot_ref[0, 0:1, :] * (s < ns - 1).astype(jnp.float32)  # (1, W)

    # vertical taps: sublane roll inside the strip, halo row spliced into the
    # first/last row via a single row-index compare (broadcasts against (1,W)).
    row = jax.lax.broadcasted_iota(jnp.int32, (TH, 1), 0)
    above = jnp.where(row == 0, top, _roll(x, 1, 0))             # x[i-1]
    below = jnp.where(row == TH - 1, bot, _roll(x, TH - 1, 0))   # x[i+1]

    t = above + 2.0 * x + below                    # vertical [1, 2, 1]
    u = above - below                              # vertical [1, 0, -1]

    # horizontal taps: lane rolls by +-1 with column-boundary masks
    col = jax.lax.broadcasted_iota(jnp.int32, (1, W), 1)
    has_l = (col != 0).astype(jnp.float32)
    has_r = (col != W - 1).astype(jnp.float32)

    t_l = _roll(t, 1, 1) * has_l
    t_r = _roll(t, W - 1, 1) * has_r
    u_l = _roll(u, 1, 1) * has_l
    u_r = _roll(u, W - 1, 1) * has_r

    gx = t_l - t_r                                 # = Gx / 2
    gy = u_l + 2.0 * u + u_r                       # = Gy / 2
    o_ref[0] = 2.0 * jnp.sqrt(gx * gx + gy * gy)


# ---------------------------------------------------------------------------
# pallas_call wrappers
# ---------------------------------------------------------------------------
def _sobel_flat(x3, W, vmem_limit):
    """x3: (G, P, L) -- G grid steps of P whole flattened planes each."""
    G, P, L = x3.shape

    idx = jnp.arange(L, dtype=jnp.int32)
    colf = idx % W
    masks = jnp.stack(
        [idx >= W, idx < L - W, colf != 0, colf != W - 1], axis=0
    ).astype(jnp.float32)                          # (4, L), tiny

    return pl.pallas_call(
        functools.partial(_sobel_flat_kernel, W=W),
        out_shape=jax.ShapeDtypeStruct((G, P, L), jnp.float32),
        grid_spec=pltpu.PrefetchScalarGridSpec(
            num_scalar_prefetch=0,
            grid=(G,),
            in_specs=[
                pl.BlockSpec((1, P, L), lambda g: (g, 0, 0)),
                pl.BlockSpec((4, L), lambda g: (0, 0)),
            ],
            out_specs=pl.BlockSpec((1, P, L), lambda g: (g, 0, 0)),
        ),
        compiler_params=pltpu.CompilerParams(
            dimension_semantics=("parallel",),
            vmem_limit_bytes=vmem_limit,
        ),
    )(x3, masks)


def _sobel_strips(x3, TH, vmem_limit):
    """x3: (NC, H_pad, W) with H_pad % TH == 0; processes (TH, W) row strips
    with a 1-row halo fetched via two clamped 8-row blocks."""
    NC, H_pad, W = x3.shape
    num_strips = H_pad // TH
    thb = TH // 8                 # strip height measured in 8-row blocks
    hb_last = H_pad // 8 - 1      # last valid 8-row block index

    return pl.pallas_call(
        _sobel_strip_kernel,
        out_shape=jax.ShapeDtypeStruct((NC, H_pad, W), jnp.float32),
        grid_spec=pltpu.PrefetchScalarGridSpec(
            num_scalar_prefetch=0,
            grid=(NC, num_strips),
            in_specs=[
                pl.BlockSpec((1, TH, W), lambda p, s: (p, s, 0)),
                # 8-row block ending one row above the strip (clamped at the top)
                pl.BlockSpec((1, 8, W),
                             lambda p, s: (p, jnp.maximum(s * thb - 1, 0), 0)),
                # 8-row block starting one row below the strip (clamped at the bottom)
                pl.BlockSpec((1, 8, W),
                             lambda p, s: (p, jnp.minimum((s + 1) * thb, hb_last), 0)),
            ],
            out_specs=pl.BlockSpec((1, TH, W), lambda p, s: (p, s, 0)),
        ),
        compiler_params=pltpu.CompilerParams(
            dimension_semantics=("parallel", "parallel"),
            vmem_limit_bytes=vmem_limit,
        ),
    )(x3, x3, x3)


def sobel(img, *, vmem_block_budget_bytes=None):
    """img: (N, 3, H, W) float (NCHW).  Returns (N, 3, H, W) float32 with the
    same math as the PyTorch Sobel module (per-channel sqrt(Gx^2+Gy^2))."""
    N, C, H, W = img.shape
    assert C == 3, "Sobel module expects 3-channel (RGB) input"
    x = img.astype(jnp.float32)
    NC = N * C

    cap = _vmem_capacity_bytes()
    if vmem_block_budget_bytes is None:
        # generation-aware default: ~32 MiB on 128-MiB-VMEM parts (v5e/v6e),
        # ~16 MiB on v7x (64 MiB VMEM).
        vmem_block_budget_bytes = cap // 4
    budget = int(vmem_block_budget_bytes)
    vlimit = _vmem_limit_bytes()

    # --- small, narrow planes: whole flattened planes (lane axis = H*W) -----
    L = H * W

    def flat_fits(nplanes):
        padded = _round_up(max(nplanes, 1), 8)     # sublane padding of the block
        return _LIVE_FACTOR * 4 * padded * L <= budget

    if W < 128 and flat_fits(NC):
        # everything in ONE grid step: no forced megacore split for tiny inputs
        out = _sobel_flat(x.reshape(1, NC, L), W, vlimit)
        return out.reshape(N, C, H, W)
    if W < 128 and flat_fits(1):
        out = _sobel_flat(x.reshape(NC, 1, L), W, vlimit)
        return out.reshape(N, C, H, W)

    # --- everything else: lane-dense 2-D (TH, W) row strips ------------------
    H8 = _round_up(H, 8)
    row_bytes = 4 * W
    max_th = max(8, (budget // (_LIVE_FACTOR * row_bytes)) // 8 * 8)
    if H8 <= max_th:
        TH, num_strips = H8, 1
    else:
        num_strips = _cdiv(H8, max_th)
        TH = _round_up(_cdiv(H8, num_strips), 8)   # TH <= max_th, padding <= 8*num_strips rows
    H_pad = TH * num_strips

    x3 = x.reshape(NC, H, W)
    if H_pad != H:
        # zero rows below the image reproduce the conv's zero padding; the
        # extra output rows are sliced off afterwards.
        x3 = jnp.pad(x3, ((0, 0), (0, H_pad - H), (0, 0)))
    out = _sobel_strips(x3, TH, vlimit)
    if H_pad != H:
        out = out[:, :H, :]
    return out.reshape(N, C, H, W)


# ---------------------------------------------------------------------------
# pure-JAX reference (mirrors the PyTorch forward exactly)
# ---------------------------------------------------------------------------
_GX = ((2.0, 0.0, -2.0), (4.0, 0.0, -4.0), (2.0, 0.0, -2.0))
_GY = ((2.0, 4.0, 2.0), (0.0, 0.0, 0.0), (-2.0, -4.0, -2.0))


def _sobel_ref(img):
    img = img.astype(jnp.float32)
    w = jnp.stack([jnp.asarray(_GX, jnp.float32),
                   jnp.asarray(_GY, jnp.float32)], 0)[:, None, :, :]  # (2,1,3,3)

    def one_channel(plane):  # (N, 1, H, W)
        y = jax.lax.conv_general_dilated(
            plane, w, window_strides=(1, 1), padding="SAME",
            dimension_numbers=("NCHW", "OIHW", "NCHW"))
        return jnp.sqrt(jnp.sum(y * y, axis=1, keepdims=True))

    return jnp.concatenate([one_channel(img[:, c:c + 1]) for c in range(3)], 1)


if __name__ == "__main__":
    # primary shape implied by the module (small RGB image batch) -> flat path
    x = jax.random.normal(jax.random.PRNGKey(0), (2, 3, 16, 16), dtype=jnp.float32)
    y = sobel(x)
    jax.block_until_ready(y)
    assert y.shape == x.shape
    assert jnp.allclose(y, _sobel_ref(x), atol=1e-3, rtol=1e-3), "flat path mismatch"

    # also exercise the 2-D strip path (W >= 128), including H not a multiple
    # of 8 and multi-strip tiling, via a deliberately tiny block budget
    x2 = jax.random.normal(jax.random.PRNGKey(1), (1, 3, 60, 128), dtype=jnp.float32)
    y2 = sobel(x2, vmem_block_budget_bytes=256 * 1024)
    jax.block_until_ready(y2)
    assert jnp.allclose(y2, _sobel_ref(x2), atol=1e-3, rtol=1e-3), "strip path mismatch"

    print("KERNEL_OK")
</pallas_src>

<mosaic_0001>
module attributes {stable_mosaic.version = 11 : i64} {
  func.func @_sobel_flat_kernel(%arg0: i32, %arg1: memref<1x6x256xf32, #tpu.memory_space<vmem>>, %arg2: memref<4x256xf32, #tpu.memory_space<vmem>>, %arg3: memref<1x6x256xf32, #tpu.memory_space<vmem>>) attributes {dimension_semantics = [#tpu.dimension_semantics<parallel>], iteration_bounds = array<i64: 1>, scalar_prefetch = 0 : i64, scratch_operands = 0 : i64, tpu.core_type = #tpu.core_type<tc>, window_params = [{transform_indices = @transform_0, window_bounds = array<i64: 1, 6, 256>}, {pipeline_mode = #tpu.pipeline_mode<synchronous>, transform_indices = @transform_1, window_bounds = array<i64: 4, 256>}, {transform_indices = @transform_2, window_bounds = array<i64: 1, 6, 256>}]} {
    %c0 = arith.constant 0 : index
    %c0_0 = arith.constant 0 : index
    %c0_1 = arith.constant 0 : index
    %0 = vector.load %arg1[%c0, %c0_0, %c0_1] : memref<1x6x256xf32, #tpu.memory_space<vmem>>, vector<1x6x256xf32>
    %1 = vector.shape_cast %0 : vector<1x6x256xf32> to vector<6x256xf32>
    %c0_2 = arith.constant 0 : index
    %c0_3 = arith.constant 0 : index
    %2 = vector.load %arg2[%c0_2, %c0_3] : memref<4x256xf32, #tpu.memory_space<vmem>>, vector<4x256xf32>
    %3 = vector.extract_strided_slice %2 {offsets = [0, 0], sizes = [1, 256], strides = [1, 1]} : vector<4x256xf32> to vector<1x256xf32>
    %4 = vector.extract_strided_slice %2 {offsets = [1, 0], sizes = [1, 256], strides = [1, 1]} : vector<4x256xf32> to vector<1x256xf32>
    %5 = vector.extract_strided_slice %2 {offsets = [2, 0], sizes = [1, 256], strides = [1, 1]} : vector<4x256xf32> to vector<1x256xf32>
    %6 = vector.extract_strided_slice %2 {offsets = [3, 0], sizes = [1, 256], strides = [1, 1]} : vector<4x256xf32> to vector<1x256xf32>
    %c16_i32 = arith.constant 16 : i32
    %7 = tpu.dynamic_rotate %1 by %c16_i32 dim 1 : vector<6x256xf32>, i32 -> vector<6x256xf32>
    %8 = vector.broadcast %3 : vector<1x256xf32> to vector<6x256xf32>
    %9 = arith.mulf %7, %8 : vector<6x256xf32>
    %c240_i32 = arith.constant 240 : i32
    %10 = tpu.dynamic_rotate %1 by %c240_i32 dim 1 : vector<6x256xf32>, i32 -> vector<6x256xf32>
    %11 = vector.broadcast %4 : vector<1x256xf32> to vector<6x256xf32>
    %12 = arith.mulf %10, %11 : vector<6x256xf32>
    %cst = arith.constant 2.000000e+00 : f32
    %13 = vector.broadcast %cst : f32 to vector<6x256xf32>
    %14 = arith.mulf %13, %1 : vector<6x256xf32>
    %15 = arith.addf %9, %14 : vector<6x256xf32>
    %16 = arith.addf %15, %12 : vector<6x256xf32>
    %17 = arith.subf %9, %12 : vector<6x256xf32>
    %c1_i32 = arith.constant 1 : i32
    %18 = tpu.dynamic_rotate %16 by %c1_i32 dim 1 : vector<6x256xf32>, i32 -> vector<6x256xf32>
    %19 = vector.broadcast %5 : vector<1x256xf32> to vector<6x256xf32>
    %20 = arith.mulf %18, %19 : vector<6x256xf32>
    %c255_i32 = arith.constant 255 : i32
    %21 = tpu.dynamic_rotate %16 by %c255_i32 dim 1 : vector<6x256xf32>, i32 -> vector<6x256xf32>
    %22 = vector.broadcast %6 : vector<1x256xf32> to vector<6x256xf32>
    %23 = arith.mulf %21, %22 : vector<6x256xf32>
    %c1_i32_4 = arith.constant 1 : i32
    %24 = tpu.dynamic_rotate %17 by %c1_i32_4 dim 1 : vector<6x256xf32>, i32 -> vector<6x256xf32>
    %25 = vector.broadcast %5 : vector<1x256xf32> to vector<6x256xf32>
    %26 = arith.mulf %24, %25 : vector<6x256xf32>
    %c255_i32_5 = arith.constant 255 : i32
    %27 = tpu.dynamic_rotate %17 by %c255_i32_5 dim 1 : vector<6x256xf32>, i32 -> vector<6x256xf32>
    %28 = vector.broadcast %6 : vector<1x256xf32> to vector<6x256xf32>
    %29 = arith.mulf %27, %28 : vector<6x256xf32>
    %30 = arith.subf %20, %23 : vector<6x256xf32>
    %cst_6 = arith.constant 2.000000e+00 : f32
    %31 = vector.broadcast %cst_6 : f32 to vector<6x256xf32>
    %32 = arith.mulf %31, %17 : vector<6x256xf32>
    %33 = arith.addf %26, %32 : vector<6x256xf32>
    %34 = arith.addf %33, %29 : vector<6x256xf32>
    %35 = arith.mulf %30, %30 : vector<6x256xf32>
    %36 = arith.mulf %34, %34 : vector<6x256xf32>
    %37 = arith.addf %35, %36 : vector<6x256xf32>
    %38 = math.sqrt %37 : vector<6x256xf32>
    %cst_7 = arith.constant 2.000000e+00 : f32
    %39 = vector.broadcast %cst_7 : f32 to vector<6x256xf32>
    %40 = arith.mulf %39, %38 : vector<6x256xf32>
    %c0_8 = arith.constant 0 : index
    %c0_9 = arith.constant 0 : index
    %c0_10 = arith.constant 0 : index
    %41 = vector.load %arg3[%c0_8, %c0_9, %c0_10] : memref<1x6x256xf32, #tpu.memory_space<vmem>>, vector<1x6x256xf32>
    %42 = vector.shape_cast %41 : vector<1x6x256xf32> to vector<6x256xf32>
    %43 = vector.shape_cast %40 : vector<6x256xf32> to vector<1x6x256xf32>
    tpu.vector_store %arg3[%c0_8, %c0_9, %c0_10], %43 {strides = array<i32>} : memref<1x6x256xf32, #tpu.memory_space<vmem>>, vector<1x6x256xf32>,
    return
  }
  func.func @transform_0(%arg0: i32) -> (i32, i32, i32) {
    %c0_i32 = arith.constant 0 : i32
    %c0_i32_0 = arith.constant 0 : i32
    %c0_i32_1 = arith.constant 0 : i32
    return %arg0, %c0_i32, %c0_i32_0 : i32, i32, i32
  }
  func.func @transform_1(%arg0: i32) -> (i32, i32) {
    %c0_i32 = arith.constant 0 : i32
    %c0_i32_0 = arith.constant 0 : i32
    %c0_i32_1 = arith.constant 0 : i32
    return %c0_i32, %c0_i32_0 : i32, i32
  }
  func.func @transform_2(%arg0: i32) -> (i32, i32, i32) {
    %c0_i32 = arith.constant 0 : i32
    %c0_i32_0 = arith.constant 0 : i32
    %c0_i32_1 = arith.constant 0 : i32
    return %arg0, %c0_i32, %c0_i32_0 : i32, i32, i32
  }
}

</mosaic_0001>

<bundles_post_ra>
// kernel: tpu_custom_call.1
= control target key start
LH: loop header
LB: loop body
LE: loop exit
PB: predicated region body
PF: predicated region fallthrough
CT: control target
= control target key end

     0   :  { %s193_s11 = smov 112   ;;  %s194_s12 = smov 16   ;;  %v18_v2 = vlaneseq  ;;  %s249_s0 = inlined_call_operand.vmem [shape: f32[1,6,256], index: 0, kind: input, shape index: {}]   ;;  %s250_s1 = inlined_call_operand.vmem [shape: f32[4,256], index: 1, kind: input, shape index: {}]   ;;  %s251_s2 = inlined_call_operand.vmem [shape: f32[1,6,256], index: 2, kind: output, shape index: {}]  }
   0x1   :  { %v11_v0 = vld [vmem:[%s249_s0] sm:$0x3f]  ;;  %v12_v1 = vld [vmem:[%s249_s0 + $0x8] sm:$0x3f]  ;;  %s195_s0 = smov 1  }
   0x2   :  { %44 = vrot.lane.b32.xlu1 %v11_v0, %s193_s11  ;;  %14 = vrot.lane.b32.xlu0 %v11_v0, %s194_s12  ;;  %v25_v3 = vshrl.u32 %v18_v2, 7  ;;  %v13_v8 = vld [vmem:[%s250_s1] sm:$0xff]  ;;  %v221_v9 = vand.u32 127, %v18_v2  ;;  %v71_v20 = vmul.f32 2.0, %v11_v0  ;;  %v72_v21 = vmul.f32 2.0, %v12_v1  ;;  %s196_s1 = smov 127  }
   0x4   :  { %v53_v4 = vsub.s32 1, %v25_v3  ;;  %v57_v5 = vsub.s32 5, %v25_v3  ;;  %v26_v6 = vsub.s32 0, %v25_v3  ;;  %v30_v7 = vsub.s32 4, %v25_v3 }
   0x5   :  { %vm48_vm0 = vcmp.lt.s32.totalorder %v221_v9, 112  ;;  %vm20_vm1 = vcmp.lt.s32.totalorder %v221_v9, 16  ;;  %v88_v38 = vsub.s32 2, %v25_v3  ;;  %v92_v39 = vsub.s32 6, %v25_v3 }
   0x6   :  { %46 = vrot.lane.b32.xlu1 %v12_v1, %s193_s11  ;;  %16 = vrot.lane.b32.xlu0 %v12_v1, %s194_s12  ;;  %v54_v10 = vrot.slane %v13_v8, %v53_v4  ;;  %v58_v11 = vrot.slane %v13_v8, %v57_v5  ;;  %v27_v12 = vrot.slane %v13_v8, %v26_v6  ;;  %v115_v40 = vsub.s32 3, %v25_v3 }
   0x7   :  { %v31_v13 = vrot.slane %v13_v8, %v30_v7  ;;  %v119_v41 = vsub.s32 7, %v25_v3  ;;  %v89_v43 = vrot.slane %v13_v8, %v88_v38  ;;  %v93_v44 = vrot.slane %v13_v8, %v92_v39 }
   0x8   :  { %v64_v16 = vrot.slane %v54_v10, %v53_v4  ;;  %v68_v17 = vrot.slane %v58_v11, %v53_v4  ;;  %v37_v18 = vrot.slane %v27_v12, %v26_v6  ;;  %vm83_vm2 = vcmp.lt.s32.totalorder %v221_v9, 1 }
   0x9   :  { %v41_v19 = vrot.slane %v31_v13, %v26_v6  ;;  %v116_v46 = vrot.slane %v13_v8, %v115_v40  ;;  %v120_v47 = vrot.slane %v13_v8, %v119_v41  ;;  %v99_v48 = vrot.slane %v89_v43, %v88_v38 }
   0xa   :  { %v103_v49 = vrot.slane %v93_v44, %v88_v38  ;;  %vm110_vm3 = vcmp.lt.s32.totalorder %v221_v9, 127 }
   0xb   :  { %v126_v54 = vrot.slane %v116_v46, %v115_v40  ;;  %v130_v55 = vrot.slane %v120_v47, %v115_v40 }
  0x74   :  { %v45_v14 = vpop.permute.xlu1 %44  ;;  %v15_v15 = vpop.permute.xlu0 %14 }
  0x78   :  { %v47_v22 = vpop.permute.xlu1 %46  ;;  %v17_v23 = vpop.permute.xlu0 %16 }
  0x79   :  { %v49_v24 = vsel %vm48_vm0, %v45_v14, %v47_v22  ;;  %v50_v25 = vsel %vm48_vm0, %v47_v22, %v45_v14  ;;  %v21_v26 = vsel %vm20_vm1, %v15_v15, %v17_v23  ;;  %v22_v27 = vsel %vm20_vm1, %v17_v23, %v15_v15 }
  0x7a   :  { %v69_v28 = vmul.f32 %v64_v16, %v49_v24  ;;  %v70_v29 = vmul.f32 %v68_v17, %v50_v25  ;;  %v42_v30 = vmul.f32 %v37_v18, %v22_v27  ;;  %v43_v31 = vmul.f32 %v41_v19, %v21_v26 }
  0x7c   :  { %v73_v32 = vadd.f32 %v71_v20, %v42_v30  ;;  %v74_v33 = vadd.f32 %v72_v21, %v43_v31  ;;  %v77_v34 = vsub.f32 %v42_v30, %v69_v28  ;;  %v78_v35 = vsub.f32 %v43_v31, %v70_v29 }
  0x7e   :  { %133 = vrot.lane.b32.xlu0 %v77_v34, %s195_s0  ;;  %135 = vrot.lane.b32.xlu1 %v78_v35, %s195_s0  ;;  %v76_v36 = vadd.f32 %v74_v33, %v70_v29  ;;  %v75_v37 = vadd.f32 %v73_v32, %v69_v28  ;;  %v151_v2 = vmul.f32 2.0, %v77_v34  ;;  %v152_v3 = vmul.f32 2.0, %v78_v35 }
  0x82   :  { %81 = vrot.lane.b32.xlu1 %v76_v36, %s195_s0  ;;  %79 = vrot.lane.b32.xlu0 %v75_v37, %s195_s0 }
  0x86   :  { %108 = vrot.lane.b32.xlu1 %v76_v36, %s196_s1  ;;  %106 = vrot.lane.b32.xlu0 %v75_v37, %s196_s1 }
  0x8a   :  { %143 = vrot.lane.b32.xlu1 %v78_v35, %s196_s1  ;;  %141 = vrot.lane.b32.xlu0 %v77_v34, %s196_s1 }
  0xf0   :  { %v134_v42 = vpop.permute.xlu0 %133  ;;  %v136_v45 = vpop.permute.xlu1 %135 }
  0xf1   :  { %v137_v52 = vsel %vm83_vm2, %v134_v42, %v136_v45  ;;  %v138_v53 = vsel %vm83_vm2, %v136_v45, %v134_v42 }
  0xf2   :  { %v139_v56 = vmul.f32 %v138_v53, %v99_v48  ;;  %v140_v57 = vmul.f32 %v137_v52, %v103_v49 }
  0xf4   :  { %v82_v50 = vpop.permute.xlu1 %81  ;;  %v80_v51 = vpop.permute.xlu0 %79  ;;  %v153_v8 = vadd.f32 %v151_v2, %v139_v56  ;;  %v154_v10 = vadd.f32 %v152_v3, %v140_v57 }
  0xf5   :  { %v84_v60 = vsel %vm83_vm2, %v80_v51, %v82_v50  ;;  %v85_v61 = vsel %vm83_vm2, %v82_v50, %v80_v51 }
  0xf6   :  { %v104_v4 = vmul.f32 %v99_v48, %v85_v61  ;;  %v105_v5 = vmul.f32 %v103_v49, %v84_v60 }
  0xf8   :  { %v109_v58 = vpop.permute.xlu1 %108  ;;  %v107_v59 = vpop.permute.xlu0 %106 }
  0xf9   :  { %v111_v62 = vsel %vm110_vm3, %v107_v59, %v109_v58  ;;  %v112_v63 = vsel %vm110_vm3, %v109_v58, %v107_v59 }
  0xfa   :  { %v131_v0 = vmul.f32 %v126_v54, %v111_v62  ;;  %v132_v1 = vmul.f32 %v130_v55, %v112_v63 }
  0xfc   :  { %v144_v6 = vpop.permute.xlu1 %143  ;;  %v142_v7 = vpop.permute.xlu0 %141  ;;  %v149_v13 = vsub.f32 %v104_v4, %v131_v0  ;;  %v150_v14 = vsub.f32 %v105_v5, %v132_v1 }
  0xfd   :  { %v145_v11 = vsel %vm110_vm3, %v142_v7, %v144_v6  ;;  %v146_v12 = vsel %vm110_vm3, %v144_v6, %v142_v7 }
  0xfe   :  { %v147_v15 = vmul.f32 %v145_v11, %v126_v54  ;;  %v148_v16 = vmul.f32 %v146_v12, %v130_v55  ;;  %v157_v19 = vmul.f32 %v149_v13, %v149_v13  ;;  %v158_v20 = vmul.f32 %v150_v14, %v150_v14 }
 0x100   :  { %v155_v17 = vadd.f32 %v153_v8, %v147_v15  ;;  %v156_v18 = vadd.f32 %v154_v10, %v148_v16 }
 0x102   :  { %v159_v21 = vmul.f32 %v155_v17, %v155_v17  ;;  %v160_v22 = vmul.f32 %v156_v18, %v156_v18 }
 0x104   :  { %v161_v23 = vadd.f32 %v159_v21, %v157_v19  ;;  %v162_v24 = vadd.f32 %v160_v22, %v158_v20 }
 0x106   :  { %189 = vrsqrt.f32 %v161_v23  ;;  %vm165_vm4 = vcmp.eq.f32.partialorder %v161_v23, inf  ;;  %v168_v9 = vand.u32 2147483648, %v161_v23  ;;  %vm167_vm5 = vcmp.eq.f32.partialorder %v161_v23, 0.0 }
 0x107   :  { %191 = vrsqrt.f32 %v162_v24  ;;  %vm172_vm6 = vcmp.eq.f32.partialorder %v162_v24, inf  ;;  %v175_v30 = vand.u32 2147483648, %v162_v24  ;;  %vm174_vm7 = vcmp.eq.f32.partialorder %v162_v24, 0.0 }
 0x110   :  { %v190_v25 = vpop.eup %189 }
 0x111   :  { %v192_v26 = vpop.eup %191  ;;  %v164_v27 = vmul.f32 %v190_v25, %v161_v23 }
 0x112   :  { %v171_v28 = vmul.f32 %v192_v26, %v162_v24 }
 0x113   :  { %v166_v29 = vsel %vm165_vm4, %v161_v23, %v164_v27 }
 0x114   :  { %v169_v31 = vsel %vm167_vm5, %v168_v9, %v166_v29  ;;  %v173_v32 = vsel %vm172_vm6, %v162_v24, %v171_v28 }
 0x115   :  { %v176_v33 = vsel %vm174_vm7, %v175_v30, %v173_v32  ;;  %v177_v34 = vmul.f32 2.0, %v169_v31 }
 0x116   :  { %v178_v35 = vmul.f32 2.0, %v176_v33 }
 0x117   :  { %179 = vst [vmem:[%s251_s2] sm:$0x3f] %v177_v34 }
 0x118   :  { %180 = vst [vmem:[%s251_s2 + $0x8] sm:$0x3f] %v178_v35 }

</bundles_post_ra>
